<compile_context>
chip_gen: v7x
topology: tpu7x:2x2x1
jax: 0.10.0
libtpu: 0.0.40
codegen_flags: <defaults>
</compile_context>

<pallas_src>
import jax
import jax.numpy as jnp
from jax.experimental import pallas as pl
from jax.experimental.pallas import tpu as pltpu


def _mlp_kernel(xt_ref, w1_ref, b1_ref, w2_ref, b2_ref, w3_ref, b3_ref, out_ref):
    # xt_ref : (IN, TILE_B) bf16   -- batch on the lane axis
    # w1_ref : (H, IN)  bf16        b1_ref : (H, 1) f32
    # w2_ref : (H, H)   bf16        b2_ref : (H, 1) f32
    # w3_ref : (1, H)   bf16        b3_ref : (1,)   f32 (SMEM scalar)
    # out_ref: (1, TILE_B) f32      -- lane-dense row output

    # Layer 1: bf16 MXU matmul, f32 accumulation; bias + ReLU in f32 (VPU).
    h1 = jnp.dot(w1_ref[...], xt_ref[...], preferred_element_type=jnp.float32)
    h1 = jnp.maximum(h1 + b1_ref[...], 0.0)                      # (H, TILE_B)

    # Layer 2.
    h2 = jnp.dot(w2_ref[...], h1.astype(jnp.bfloat16),
                 preferred_element_type=jnp.float32)
    h2 = jnp.maximum(h2 + b2_ref[...], 0.0)                      # (H, TILE_B)

    # Layer 3 (output_dims == 1): (1,H) @ (H,TILE_B) -> (1, TILE_B) row,
    # stored lane-dense (this is the .squeeze(1) axis layout).
    y = jnp.dot(w3_ref[...], h2.astype(jnp.bfloat16),
                preferred_element_type=jnp.float32)
    out_ref[...] = y + b3_ref[0]


def _pick_tile(batch, max_tile=4096):
    """Large batch tiles; >=2 tiles when possible so both v7x cores get work."""
    if batch <= 128:
        return batch                       # single full-batch tile
    half = (batch + 1) // 2
    tile = ((half + 127) // 128) * 128     # 128-multiple (lane alignment)
    return min(tile, max_tile)


def regression_mlp_forward(x, params, *, tile_b=None):
    """x: (batch, input_dims) float32. Returns (batch,) float32 (== .squeeze(1)).

    Weights are in PyTorch nn.Linear layout: W (out_features, in_features),
    b (out_features,).  Numerics: bf16 MXU operands with f32 accumulation
    (documented deviation from the pure-f32 PyTorch forward, ~1e-3 level).
    """
    w1, b1, w2, b2, w3, b3 = params
    batch, in_dims = x.shape
    hidden = w1.shape[0]
    assert w3.shape[0] == 1, "forward() uses .squeeze(1): output_dims must be 1"

    if tile_b is None:
        tile_b = _pick_tile(batch)
    n_tiles = pl.cdiv(batch, tile_b)       # ragged last tile handled by Pallas

    # Single fused wrapper pass over x: transpose + bf16 cast (feature-major,
    # lane-dense (IN, batch) layout).  Weights cast once; biases stay f32.
    xt_b = x.T.astype(jnp.bfloat16)                      # (IN, batch)
    w1_b = w1.astype(jnp.bfloat16)                       # (H, IN)
    w2_b = w2.astype(jnp.bfloat16)                       # (H, H)
    w3_b = w3.astype(jnp.bfloat16)                       # (1, H)
    b1_f = b1.reshape(hidden, 1).astype(jnp.float32)
    b2_f = b2.reshape(hidden, 1).astype(jnp.float32)
    b3_s = b3.reshape(-1).astype(jnp.float32)            # (1,) scalar in SMEM

    flops = 2 * batch * (in_dims * hidden + hidden * hidden + hidden)
    bytes_accessed = (
        xt_b.size * 2 + batch * 4                        # x in, y out
        + (w1_b.size + w2_b.size + w3_b.size) * 2        # bf16 weights
        + (b1_f.size + b2_f.size + b3_s.size) * 4        # f32 biases
    )

    y_row = pl.pallas_call(
        _mlp_kernel,
        out_shape=jax.ShapeDtypeStruct((1, batch), jnp.float32),
        grid=(n_tiles,),
        in_specs=[
            pl.BlockSpec((in_dims, tile_b), lambda i: (0, i)),   # x^T: batch-tiled, lane-dense
            pl.BlockSpec((hidden, in_dims), lambda i: (0, 0)),   # W1 (VMEM-resident)
            pl.BlockSpec((hidden, 1),       lambda i: (0, 0)),   # b1
            pl.BlockSpec((hidden, hidden),  lambda i: (0, 0)),   # W2
            pl.BlockSpec((hidden, 1),       lambda i: (0, 0)),   # b2
            pl.BlockSpec((1, hidden),       lambda i: (0, 0)),   # W3 row
            pl.BlockSpec(memory_space=pltpu.MemorySpace.SMEM),   # b3 scalar
        ],
        out_specs=pl.BlockSpec((1, tile_b), lambda i: (0, i)),   # lane-dense output row
        compiler_params=pltpu.CompilerParams(
            dimension_semantics=("parallel",),        # megacore sharding on v7x
            vmem_limit_bytes=32 * 1024 * 1024,        # tiles are small; safe everywhere
        ),
        cost_estimate=pl.CostEstimate(
            flops=flops, transcendentals=0, bytes_accessed=bytes_accessed),
    )(xt_b, w1_b, b1_f, w2_b, b2_f, w3_b, b3_s)

    # .squeeze(1) from the PyTorch forward (batch lives on the lane axis here).
    return y_row[0]


def init_params(key, input_dims, hidden_dims, output_dims):
    """Deterministic init mimicking nn.Linear (uniform(+-1/sqrt(fan_in))).
    Weights stored in PyTorch layout: (out_features, in_features)."""
    ks = jax.random.split(key, 6)

    def linear(kw, kb, fan_in, fan_out):
        bound = 1.0 / jnp.sqrt(jnp.float32(fan_in))
        w = jax.random.uniform(kw, (fan_out, fan_in), jnp.float32, -bound, bound)
        b = jax.random.uniform(kb, (fan_out,), jnp.float32, -bound, bound)
        return w, b

    w1, b1 = linear(ks[0], ks[1], input_dims, hidden_dims)
    w2, b2 = linear(ks[2], ks[3], hidden_dims, hidden_dims)
    w3, b3 = linear(ks[4], ks[5], hidden_dims, output_dims)
    return (w1, b1, w2, b2, w3, b3)


def reference_forward(x, params):
    """Pure-JAX reference mirroring the kernel's numerics (bf16 MXU operands,
    f32 accumulation), structured like the PyTorch forward."""
    w1, b1, w2, b2, w3, b3 = params
    h1 = jnp.maximum(
        jnp.dot(x.astype(jnp.bfloat16), w1.T.astype(jnp.bfloat16),
                preferred_element_type=jnp.float32) + b1, 0.0)
    h2 = jnp.maximum(
        jnp.dot(h1.astype(jnp.bfloat16), w2.T.astype(jnp.bfloat16),
                preferred_element_type=jnp.float32) + b2, 0.0)
    y = jnp.dot(h2.astype(jnp.bfloat16), w3.T.astype(jnp.bfloat16),
                preferred_element_type=jnp.float32) + b3
    return jnp.squeeze(y, axis=1)


# TODO(synk): training utilities of the module (SGD step, MSELoss, r_squared,
# train/eval loops) are host-side PyTorch code, not part of the forward pass,
# and are not implemented here.

if __name__ == "__main__":
    batch, input_dims, hidden_dims, output_dims = 512, 16, 32, 1

    key = jax.random.PRNGKey(0)
    k_x, k_p = jax.random.split(key)
    x = jax.random.normal(k_x, (batch, input_dims), jnp.float32)
    params = init_params(k_p, input_dims, hidden_dims, output_dims)

    y = regression_mlp_forward(x, params)        # 2 tiles of 256 (per-core on v7x)
    y = jax.block_until_ready(y)

    y_ref = reference_forward(x, params)
    assert y.shape == (batch,)
    err = float(jnp.max(jnp.abs(y - y_ref)))
    assert jnp.allclose(y, y_ref, atol=1e-3, rtol=1e-3), err

    print("KERNEL_OK")
</pallas_src>

<mosaic_0001>
module attributes {stable_mosaic.version = 11 : i64} {
  func.func @_mlp_kernel(%arg0: i32, %arg1: memref<16x256xbf16, #tpu.memory_space<vmem>>, %arg2: memref<32x16xbf16, #tpu.memory_space<vmem>>, %arg3: memref<32x1xf32, #tpu.memory_space<vmem>>, %arg4: memref<32x32xbf16, #tpu.memory_space<vmem>>, %arg5: memref<32x1xf32, #tpu.memory_space<vmem>>, %arg6: memref<1x32xbf16, #tpu.memory_space<vmem>>, %arg7: memref<1xf32, #tpu.memory_space<smem>>, %arg8: memref<1x256xf32, #tpu.memory_space<vmem>>) attributes {dimension_semantics = [#tpu.dimension_semantics<parallel>], iteration_bounds = array<i64: 2>, scalar_prefetch = 0 : i64, scratch_operands = 0 : i64, tpu.core_type = #tpu.core_type<tc>, window_params = [{transform_indices = @transform_0, window_bounds = array<i64: 16, 256>}, {pipeline_mode = #tpu.pipeline_mode<synchronous>, transform_indices = @transform_1, window_bounds = array<i64: 32, 16>}, {pipeline_mode = #tpu.pipeline_mode<synchronous>, transform_indices = @transform_2, window_bounds = array<i64: 32, 1>}, {pipeline_mode = #tpu.pipeline_mode<synchronous>, transform_indices = @transform_3, window_bounds = array<i64: 32, 32>}, {pipeline_mode = #tpu.pipeline_mode<synchronous>, transform_indices = @transform_4, window_bounds = array<i64: 32, 1>}, {pipeline_mode = #tpu.pipeline_mode<synchronous>, transform_indices = @transform_5, window_bounds = array<i64: 1, 32>}, {transform_indices = @transform_6, window_bounds = array<i64: 1>}, {transform_indices = @transform_7, window_bounds = array<i64: 1, 256>}]} {
    %c0 = arith.constant 0 : index
    %c0_0 = arith.constant 0 : index
    %0 = vector.load %arg2[%c0, %c0_0] : memref<32x16xbf16, #tpu.memory_space<vmem>>, vector<32x16xbf16>
    %c0_1 = arith.constant 0 : index
    %c0_2 = arith.constant 0 : index
    %1 = vector.load %arg1[%c0_1, %c0_2] : memref<16x256xbf16, #tpu.memory_space<vmem>>, vector<16x256xbf16>
    %cst = arith.constant dense<0.000000e+00> : vector<32x256xf32>
    %2 = tpu.matmul %0, %1, %cst {dimension_numbers = #tpu.dot_dimension_numbers<[1], [0], [0], [1], [0, 0, 1, 1], [], []>} : vector<32x16xbf16>, vector<16x256xbf16>, vector<32x256xf32> -> vector<32x256xf32>
    %c0_3 = arith.constant 0 : index
    %c0_4 = arith.constant 0 : index
    %3 = vector.load %arg3[%c0_3, %c0_4] : memref<32x1xf32, #tpu.memory_space<vmem>>, vector<32x1xf32>
    %4 = vector.broadcast %3 : vector<32x1xf32> to vector<32x256xf32>
    %5 = arith.addf %2, %4 : vector<32x256xf32>
    %cst_5 = arith.constant 0.000000e+00 : f32
    %6 = vector.broadcast %cst_5 : f32 to vector<32x256xf32>
    %7 = arith.maximumf %5, %6 : vector<32x256xf32>
    %c0_6 = arith.constant 0 : index
    %c0_7 = arith.constant 0 : index
    %8 = vector.load %arg4[%c0_6, %c0_7] : memref<32x32xbf16, #tpu.memory_space<vmem>>, vector<32x32xbf16>
    %9 = arith.truncf %7 : vector<32x256xf32> to vector<32x256xbf16>
    %cst_8 = arith.constant dense<0.000000e+00> : vector<32x256xf32>
    %10 = tpu.matmul %8, %9, %cst_8 {dimension_numbers = #tpu.dot_dimension_numbers<[1], [0], [0], [1], [0, 0, 1, 1], [], []>} : vector<32x32xbf16>, vector<32x256xbf16>, vector<32x256xf32> -> vector<32x256xf32>
    %c0_9 = arith.constant 0 : index
    %c0_10 = arith.constant 0 : index
    %11 = vector.load %arg5[%c0_9, %c0_10] : memref<32x1xf32, #tpu.memory_space<vmem>>, vector<32x1xf32>
    %12 = vector.broadcast %11 : vector<32x1xf32> to vector<32x256xf32>
    %13 = arith.addf %10, %12 : vector<32x256xf32>
    %cst_11 = arith.constant 0.000000e+00 : f32
    %14 = vector.broadcast %cst_11 : f32 to vector<32x256xf32>
    %15 = arith.maximumf %13, %14 : vector<32x256xf32>
    %c0_12 = arith.constant 0 : index
    %c0_13 = arith.constant 0 : index
    %16 = vector.load %arg6[%c0_12, %c0_13] : memref<1x32xbf16, #tpu.memory_space<vmem>>, vector<1x32xbf16>
    %17 = arith.truncf %15 : vector<32x256xf32> to vector<32x256xbf16>
    %cst_14 = arith.constant dense<0.000000e+00> : vector<1x256xf32>
    %18 = tpu.matmul %16, %17, %cst_14 {dimension_numbers = #tpu.dot_dimension_numbers<[1], [0], [0], [1], [0, 0, 1, 1], [], []>} : vector<1x32xbf16>, vector<32x256xbf16>, vector<1x256xf32> -> vector<1x256xf32>
    %c0_15 = arith.constant 0 : index
    %19 = memref.load %arg7[%c0_15] : memref<1xf32, #tpu.memory_space<smem>>
    %20 = vector.broadcast %19 : f32 to vector<1x256xf32>
    %21 = arith.addf %18, %20 : vector<1x256xf32>
    %c0_16 = arith.constant 0 : index
    %c0_17 = arith.constant 0 : index
    %22 = vector.load %arg8[%c0_16, %c0_17] : memref<1x256xf32, #tpu.memory_space<vmem>>, vector<1x256xf32>
    tpu.vector_store %arg8[%c0_16, %c0_17], %21 {strides = array<i32>} : memref<1x256xf32, #tpu.memory_space<vmem>>, vector<1x256xf32>,
    return
  }
  func.func @transform_0(%arg0: i32) -> (i32, i32) {
    %c0_i32 = arith.constant 0 : i32
    %c0_i32_0 = arith.constant 0 : i32
    return %c0_i32, %arg0 : i32, i32
  }
  func.func @transform_1(%arg0: i32) -> (i32, i32) {
    %c0_i32 = arith.constant 0 : i32
    %c0_i32_0 = arith.constant 0 : i32
    %c0_i32_1 = arith.constant 0 : i32
    return %c0_i32, %c0_i32_0 : i32, i32
  }
  func.func @transform_2(%arg0: i32) -> (i32, i32) {
    %c0_i32 = arith.constant 0 : i32
    %c0_i32_0 = arith.constant 0 : i32
    %c0_i32_1 = arith.constant 0 : i32
    return %c0_i32, %c0_i32_0 : i32, i32
  }
  func.func @transform_3(%arg0: i32) -> (i32, i32) {
    %c0_i32 = arith.constant 0 : i32
    %c0_i32_0 = arith.constant 0 : i32
    %c0_i32_1 = arith.constant 0 : i32
    return %c0_i32, %c0_i32_0 : i32, i32
  }
  func.func @transform_4(%arg0: i32) -> (i32, i32) {
    %c0_i32 = arith.constant 0 : i32
    %c0_i32_0 = arith.constant 0 : i32
    %c0_i32_1 = arith.constant 0 : i32
    return %c0_i32, %c0_i32_0 : i32, i32
  }
  func.func @transform_5(%arg0: i32) -> (i32, i32) {
    %c0_i32 = arith.constant 0 : i32
    %c0_i32_0 = arith.constant 0 : i32
    %c0_i32_1 = arith.constant 0 : i32
    return %c0_i32, %c0_i32_0 : i32, i32
  }
  func.func @transform_6(%arg0: i32) -> i32 {
    %c0_i32 = arith.constant 0 : i32
    %c0_i32_0 = arith.constant 0 : i32
    return %c0_i32 : i32
  }
  func.func @transform_7(%arg0: i32) -> (i32, i32) {
    %c0_i32 = arith.constant 0 : i32
    %c0_i32_0 = arith.constant 0 : i32
    return %c0_i32, %arg0 : i32, i32
  }
}

</mosaic_0001>

<bundles_post_ra>
// kernel: tpu_custom_call.1
= control target key start
LH: loop header
LB: loop body
LE: loop exit
PB: predicated region body
PF: predicated region fallthrough
CT: control target
= control target key end

     0   :  { %s1048_s0 = inlined_call_operand.vmem [shape: bf16[16,512], index: 0, kind: input, shape index: {}]   ;;  %s1049_s1 = inlined_call_operand.vmem [shape: bf16[32,16], index: 1, kind: input, shape index: {}]   ;;  %s1050_s2 = inlined_call_operand.vmem [shape: f32[32,1], index: 2, kind: input, shape index: {}]   ;;  %s1051_s3 = inlined_call_operand.vmem [shape: bf16[32,32], index: 3, kind: input, shape index: {}]   ;;  %s1052_s4 = inlined_call_operand.vmem [shape: f32[32,1], index: 4, kind: input, shape index: {}]   ;;  %s1053_s5 = inlined_call_operand.vmem [shape: bf16[1,32], index: 5, kind: input, shape index: {}]   ;;  %s1054_s6 = inlined_call_operand.<no memory space> [shape: f32[1], index: 6, kind: input, shape index: {}]   ;;  %s1055_s7 = inlined_call_operand.hbm [shape: f32[1,512], index: 7, kind: output, shape index: {}]  }
   0x1   :  { %12 = sst [smem:[#allocation2]] %s1054_s6 }
   0x2   :  { %13 = vsyncpa [#allocation5], 0 }
   0x3   :  { %15 = vsyncpa [#allocation5 + $0x1], 0  ;;  %s889_s26 = smov 0   ;;  %s891_s27 = smov 0  }
   0x4   :  { %s893_s28 = smov 0   ;;  %s895_s29 = smov 0  }
   0x5 LB: > { %s701_s6 = sadd.s32 4294967295, %s841_s29   ;;  %s702_s30 = sadd.s32 4294967294, %s841_s29   ;;  %s841_s29 = sphi %s895_s29, %s1061_s29   ;;  %s837_s28 = sphi %s893_s28, %s1060_s28   ;;  %s833_s27 = sphi %s891_s27, %s1059_s27   ;;  %s829_s26 = sphi %s889_s26, %s1058_s26  }
   0x6   : > { %s912_s8 = sadd.s32 1, %s841_s29   ;;  %s28_s9 = sadd.s32 1, %s837_s28 }
   0x7   : > { %s25_s10 = ssub.s32 %s841_s29, %s912_s8  ;;  %p35_p0 = scmp.ne.s32.totalorder %s837_s28, %s833_s27 }
   0x8   : > { %p26_p1 = scmp.eq.s32.totalorder %s25_s10, 0  ;;  %p36_p2 = scmp.eq.s32.totalorder %s841_s29, 0 }
   0x9   : > { %p191_p3 = scmp.eq.s32.totalorder %s701_s6, 1  ;;  %p196_p4 = scmp.ne.s32.totalorder %s833_s27, %s829_s26 }
   0xa   : > { %s925_s11 = scalar_select %p26_p1, %s837_s28, %s28_s9  }
   0xb   : > { %p37_p5 = por %p36_p2, %p35_p0  ;;  %p927_p6 = por %p191_p3, %p35_p0 }
   0xc   : > { %p197_p7 = scmp.eq.s32.totalorder %s702_s30, 1  ;;  %p704_p9 = scmp.ge.s32.totalorder %s841_s29, 2 }
   0xe   : > { %p931_p8 = por %p197_p7, %p196_p4  ;;  %231 = sbr.rel (%p704_p9) target bundleno = 28 (0x1c), region = 40 }
  0x15   : > { %234 = sbr.rel (!%p37_p5) target bundleno = 28 (0x1c), region = 44  ;;  %s236_s14 = sand.u32 (%p37_p5), 1, %s837_s28  }
  0x16   : > { %s727_s15 = sshll.u32 (%p37_p5), %s841_s29, 3  ;;  %s705_s16 = sshll.u32 (%p37_p5), %s236_s14, 4 }
  0x17   : > { %s241_s19 = scalar_lea.vmem (%p37_p5), %s1048_s0, %s727_s15  ;;  %s238_s20 = scalar_lea.vmem (%p37_p5), [#allocation3], %s705_s16 }
  0x18   : > { %v271_v0 = vld [vmem:[%s241_s19] sm:$0xff] (%p37_p5)  ;;  %v273_v1 = vld [vmem:[%s241_s19 + $0x10] sm:$0xff] (%p37_p5) }
  0x19   : > { %272 = vst [vmem:[%s238_s20] sm:$0xff] (%p37_p5), %v271_v0  ;;  %274 = vst [vmem:[%s238_s20 + $0x8] sm:$0xff] (%p37_p5), %v273_v1 }
  0x1c PF: > { %p708_p10 = scmp.ge.s32.totalorder %s841_s29, 1  ;;  %p279_p11 = scmp.lt.s32.totalorder %s841_s29, 3 }
  0x1e   : > { %p280_p12 = pnand %p708_p10, %p279_p11 }
  0x1f   : > { %s946_s21 = sand.u32 (!%p280_p12), 1, %s833_s27   ;;  %v843_v2 = vmov (!%p280_p12), 0   ;;  %v326_v3 = vld [vmem:[%s1050_s2] sm:$0xff] (!%p280_p12)  ;;  %v328_v4 = vld [vmem:[%s1050_s2 + $0x10] sm:$0xff] (!%p280_p12)  ;;  %v327_v7 = vld [vmem:[%s1050_s2 + $0x8] sm:$0xff] (!%p280_p12)  ;;  %vm370_vm0 = vcmask (!%p280_p12), 130048  }
  0x20   : > { %283 = sbr.rel (%p280_p12) target bundleno = 740 (0x2e4), region = 82  ;;  %s709_s22 = sshll.u32 (!%p280_p12), %s946_s21, 4  ;;  %409 = vmatprep.mubr.bf16.mxu0 (!%p280_p12), %v843_v2  ;;  %770 = vset.pattern.permute.xlu0 (!%p280_p12), %v843_v2  ;;  %v329_v8 = vld [vmem:[%s1050_s2 + $0x18] sm:$0xff] (!%p280_p12)  ;;  %v775_v9 = vld [vmem:[%s1049_s1] sm:$0xff] (!%p280_p12)   ;;  %v447_v11 = vld [vmem:[%s1052_s4 + $0x8] sm:$0xff] (!%p280_p12)  ;;  %vm480_vm1 = vcmask (!%p280_p12), 261120  }
  0x21   : > { %771 = vset.pattern.permute.xlu1 (!%p280_p12), %v843_v2  ;;  %519 = vmatprep.mubr.bf16.mxu1 (!%p280_p12), %v843_v2  ;;  %s288_s9 = scalar_lea.vmem (!%p280_p12), [#allocation3], %s709_s22  ;;  %v446_v10 = vld [vmem:[%s1052_s4] sm:$0xff] (!%p280_p12)  ;;  %v448_v12 = vld [vmem:[%s1052_s4 + $0x10] sm:$0xff] (!%p280_p12)  ;;  %v449_v13 = vld [vmem:[%s1052_s4 + $0x18] sm:$0xff] (!%p280_p12)  ;;  %s553_s22 = sld [smem:[#allocation2]] (!%p280_p12) }
  0x22   : > { %v772_v5 = vld [vmem:[%s288_s9 + $0x4] ss:$8 sps:$4 sm:$0xff] (!%p280_p12)   ;;  %332 = vperm.xlu0 (!%p280_p12), %770, %v326_v3   ;;  %342 = vperm.xlu1 (!%p280_p12), %771, %v328_v4   ;;  %v774_v6 = vld [vmem:[%s288_s9] ss:$8 sps:$4 sm:$0xff] (!%p280_p12)   ;;  %s710_s23 = sshll.u32 (!%p280_p12), %s946_s21, 1  ;;  %s728_s24 = sshll.u32 (!%p280_p12), %s701_s6, 5 }
  0x23   : > { %377 = vmatprep.subr.bf16.mxu0 (!%p280_p12), %v772_v5  ;;  %v776_v14 = vld [vmem:[%s1049_s1 + $0x8] sm:$0xff] (!%p280_p12)   ;;  %v777_v47 = vld [vmem:[%s1051_s3] sm:$0xff] (!%p280_p12)   ;;  %s316_s25 = scalar_lea.vmem (!%p280_p12), [#allocation4], %s710_s23  ;;  %s1004_s14 = scalar_lea.hbm (!%p280_p12), %s1055_s7, %s728_s24 }
  0x24   : > { %378 = vmatpush1.bf16.msra.mxu0 (!%p280_p12), %v774_v6  ;;  %v778_v48 = vld [vmem:[%s1051_s3 + $0x8] sm:$0xff] (!%p280_p12)   ;;  %s637_s30 = sshll.u32 (!%p280_p12), %s316_s25, 4  ;;  %s623_s15 = scalar_lea.sflag (!%p280_p12), [#allocation5], %s946_s21  ;;  %s1006_s30 = int_to_ptr.vmem [resolvable:$true] %s637_s30 }
  0x25   : > { %s779_s16 = scalar_lea.vmem (!%p280_p12), %s1006_s30, 32  ;;  %s845_s6 = smov (!%p280_p12), [#allocation4]  }
  0x26   : > { %337 = vperm.xlu0 (!%p280_p12), %770, %v327_v7   ;;  %347 = vperm.xlu1 (!%p280_p12), %771, %v329_v8   ;;  %p780_p13 = scmp.ne.s32.totalorder (!%p280_p12), %s1006_s30, %s779_s16  ;;  %s783_s17 = sshll.u32 (!%p280_p12), %s845_s6, 4  ;;  %s784_s17 = int_to_ptr.vmem [resolvable:$false] %s783_s17 }
  0x27   : > { %715 = vmatmul.mubr.msk.bf16.vlgmr.msra.gmra.mrb[0].mxu0 %vm370_vm0, %v775_v9  ;;  %s785_s18 = scalar_lea.vmem %s784_s17, 64  ;;  %p786_p2 = scmp.lt.s32.totalorder %s1006_s30, %s784_s17 }
  0x28   : > { %419 = vmatprep.mubr.bf16.mxu0 %v843_v2  ;;  %p781_p0 = pnand %p780_p13, %p927_p6  ;;  %p787_p3 = scmp.lt.s32.totalorder %s785_s18, %s779_s16 }
  0x2a   : > { %452 = vperm.xlu0 %770, %v446_v10   ;;  %457 = vperm.xlu1 %771, %v447_v11   ;;  %p782_p1 = pneg %p781_p0  ;;  %p788_p4 = por %p787_p3, %p786_p2 }
  0x2c   : > { %p789_p5 = pnand %p788_p4, %p782_p1 }
  0x2e   : > { %462 = vperm.xlu0 %770, %v448_v12   ;;  %467 = vperm.xlu1 %771, %v449_v13  }
  0x2f   : > { %716 = vmatmul.mubr.msk.bf16.gmra.mrb[4].mxu0 %vm370_vm0, %v776_v14 }
  0x30   : > { %590 = vmatprep.mubr.bf16.mxu0 %v843_v2 }
  0xa1   : > { %v333_v15 = vpop.permute.xlu0 %332  ;;  %v343_v24 = vpop.permute.xlu1 %342 }
  0xa5   : > { %v338_v19 = vpop.permute.xlu0 %337  ;;  %v348_v35 = vpop.permute.xlu1 %347 }
  0xa9   : > { %v453_v49 = vpop.permute.xlu0 %452  ;;  %v458_v53 = vpop.permute.xlu1 %457 }
  0xad   : > { %v463_v0 = vpop.permute.xlu0 %462  ;;  %v468_v5 = vpop.permute.xlu1 %467 }
  0xfa   : > { %v411_v16 = vpop.f32.mrb[0].mxu0 }
  0xfb   : > { %v412_v17 = vadd.f32 %v411_v16, %v333_v15  ;;  %v413_v18 = vpop.f32.mrb[1].mxu0 }
  0xfc   : > { %v414_v20 = vadd.f32 %v413_v18, %v333_v15  ;;  %v415_v21 = vpop.f32.mrb[2].mxu0  ;;  %v844_v18 = vmov 1966171168  }
  0xfd   : > { %v416_v22 = vadd.f32 %v415_v21, %v338_v19  ;;  %v417_v23 = vpop.f32.mrb[3].mxu0  ;;  %v430_v26 = vmax.f32 %v412_v17, 0.0  ;;  %v548_v17 = vld [vmem:[%s1053_s5] sm:$0x1]  ;;  %v554_v21 = vstv %s553_s22 }
  0xfe   : > { %v418_v25 = vadd.f32 %v417_v23, %v338_v19  ;;  %v431_v28 = vmax.f32 %v414_v20, 0.0  ;;  %v603_v19 = vunpack.c.l.s4 %v844_v18  ;;  %v605_v20 = vlaneseq }
  0xff   : > { %v432_v27 = vmax.f32 %v416_v22, 0.0 }
 0x100   : > { %v433_v29 = vmax.f32 %v418_v25, 0.0  ;;  %v604_v22 = vunpack.c.0.s8 %v603_v19  ;;  %v606_v23 = vshrl.u32 %v605_v20, 7  ;;  %vm619_vm2 = vcmp.lt.s32.totalorder %v605_v20, 256 }
 0x101   : > { %v442_v30 = vpack.c.bf16 %v432_v27, %v430_v26 }
 0x102   : > { %v421_v31 = vpop.f32.mrb[4].mxu0  ;;  %v443_v32 = vpack.c.bf16 %v433_v29, %v431_v28  ;;  %v607_v28 = vsub.s32 %v604_v22, %v606_v23 }
 0x103   : > { %v422_v33 = vadd.f32 %v421_v31, %v343_v24  ;;  %v423_v34 = vpop.f32.mrb[5].mxu0 }
 0x104   : > { %v424_v36 = vadd.f32 %v423_v34, %v343_v24  ;;  %v425_v37 = vpop.f32.mrb[6].mxu0  ;;  %487 = vmatprep.subr.bf16.mxu1 %v443_v32 }
 0x105   : > { %v426_v38 = vadd.f32 %v425_v37, %v348_v35  ;;  %v427_v39 = vpop.f32.mrb[7].mxu0  ;;  %488 = vmatpush1.bf16.msra.mxu1 %v442_v30  ;;  %v434_v41 = vmax.f32 %v422_v33, 0.0 }
 0x106   : > { %v428_v40 = vadd.f32 %v427_v39, %v348_v35  ;;  %v435_v43 = vmax.f32 %v424_v36, 0.0 }
 0x107   : > { %v436_v42 = vmax.f32 %v426_v38, 0.0 }
 0x108   : > { %v437_v44 = vmax.f32 %v428_v40, 0.0 }
 0x109   : > { %v444_v45 = vpack.c.bf16 %v436_v42, %v434_v41 }
 0x10a   : > { %v445_v46 = vpack.c.bf16 %v437_v44, %v435_v43 }
 0x10c   : > { %489 = vmatprep.subr.bf16.mxu1 %v445_v46 }
 0x10d   : > { %490 = vmatpush1.bf16.msra.mxu1 %v444_v45 }
 0x110   : > { %719 = vmatmul.mubr.msk.bf16.vlgmr.msra.gmra.mrb[0].mxu1 %vm480_vm1, %v777_v47 }
 0x111   : > { %529 = vmatprep.mubr.bf16.mxu1 %v843_v2 }
 0x118   : > { %720 = vmatmul.mubr.msk.bf16.gmra.mrb[4].mxu1 %vm480_vm1, %v778_v48 }
 0x1e3   : > { %v521_v50 = vpop.f32.mrb[0].mxu1 }
 0x1e4   : > { %v522_v51 = vadd.f32 %v521_v50, %v453_v49  ;;  %v523_v52 = vpop.f32.mrb[1].mxu1 }
 0x1e5   : > { %v524_v54 = vadd.f32 %v523_v52, %v453_v49  ;;  %v525_v55 = vpop.f32.mrb[2].mxu1 }
 0x1e6   : > { %v526_v56 = vadd.f32 %v525_v55, %v458_v53  ;;  %v527_v57 = vpop.f32.mrb[3].mxu1  ;;  %v540_v59 = vmax.f32 %v522_v51, 0.0 }
 0x1e7   : > { %v528_v58 = vadd.f32 %v527_v57, %v458_v53  ;;  %v541_v61 = vmax.f32 %v524_v54, 0.0 }
 0x1e8   : > { %v542_v60 = vmax.f32 %v526_v56, 0.0 }
 0x1e9   : > { %v543_v62 = vmax.f32 %v528_v58, 0.0 }
 0x1ea   : > { %v549_v63 = vpack.c.bf16 %v542_v60, %v540_v59 }
 0x1eb   : > { %v550_v1 = vpack.c.bf16 %v543_v62, %v541_v61  ;;  %v531_v2 = vpop.f32.mrb[4].mxu1 }
 0x1ec   : > { %v532_v3 = vadd.f32 %v531_v2, %v463_v0  ;;  %v533_v4 = vpop.f32.mrb[5].mxu1 }
 0x1ed   : > { %v534_v6 = vadd.f32 %v533_v4, %v463_v0  ;;  %v535_v7 = vpop.f32.mrb[6].mxu1  ;;  %558 = vmatprep.subr.bf16.mxu0 %v550_v1 }
 0x1ee   : > { %v536_v8 = vadd.f32 %v535_v7, %v468_v5  ;;  %v537_v9 = vpop.f32.mrb[7].mxu1  ;;  %559 = vmatpush1.bf16.msra.mxu0 %v549_v63  ;;  %v544_v11 = vmax.f32 %v532_v3, 0.0 }
 0x1ef   : > { %v538_v10 = vadd.f32 %v537_v9, %v468_v5  ;;  %v545_v13 = vmax.f32 %v534_v6, 0.0 }
 0x1f0   : > { %v546_v12 = vmax.f32 %v536_v8, 0.0 }
 0x1f1   : > { %v547_v14 = vmax.f32 %v538_v10, 0.0 }
 0x1f2   : > { %v551_v15 = vpack.c.bf16 %v546_v12, %v544_v11 }
 0x1f3   : > { %v552_v16 = vpack.c.bf16 %v547_v14, %v545_v13 }
 0x1f5   : > { %560 = vmatprep.subr.bf16.mxu0 %v552_v16 }
 0x1f6   : > { %561 = vmatpush1.bf16.msra.mxu0 %v551_v15 }
 0x1f9   : > { %721 = vmatmul.mubr.msk.bf16.vlgmr.msra.gmra.mrb[8].mxu0 %vm480_vm1, %v548_v17 }
 0x2cc   : > { %v592_v24 = vpop.f32.mrb[8].mxu0 }
 0x2cd   : > { %v593_v25 = vadd.f32 %v592_v24, %v554_v21  ;;  %v594_v26 = vpop.f32.mrb[9].mxu0 }
 0x2ce   : > { %v595_v27 = vadd.f32 %v594_v26, %v554_v21  ;;  %v596_v29 = vpop.f32.mrb[10].mxu0 }
 0x2cf   : > { %v597_v30 = vpop.f32.mrb[11].mxu0 }
 0x2d0   : > { %v601_v31 = vcombine.low %v593_v25, %v595_v27 }
 0x2d2   : > { %v608_v32 = vrot.slane %v601_v31, %v607_v28 }
 0x2d4   : > { %v615_v33 = vrot.slane %v608_v32, %v607_v28 }
 0x2d6   : > { %621 = vst.msk [vmem:[%s316_s25] sm:$0x3] %vm619_vm2, %v615_v33 }
 0x2d7   : > { %792 = shalt.err (!%p789_p5)
}
 0x2d8   : > { %s793_s21 = scalar_lea.hbm %s1004_s14, 32  ;;  %s797_s22 = scalar_lea.hbm %s1055_s7, 64 }
 0x2d9   : > { %p794_p7 = scmp.ne.s32.totalorder %s1004_s14, %s793_s21  ;;  %p798_p12 = scmp.lt.u32.totalorder %s1004_s14, %s1055_s7 }
 0x2da   : > { %p799_p13 = scmp.lt.u32.totalorder %s797_s22, %s793_s21  ;;  %p801_p1 = scmp.lt.u32.totalorder %s793_s21, %s1004_s14 }
 0x2db   : > { %p795_p10 = pnand %p794_p7, %p927_p6 }
 0x2dc   : > { %p800_p0 = por %p799_p13, %p798_p12 }
 0x2dd   : > { %p796_p11 = pneg %p795_p10 }
 0x2de   : > { %p802_p2 = por %p801_p1, %p800_p0 }
 0x2e0   : > { %p803_p3 = pnand %p802_p2, %p796_p11 }
 0x2e2   : > { %806 = shalt.err (!%p803_p3)
}
 0x2e3   : > { %729 = dma.vmem_to_hbm [thread:$0]  (%p927_p6), %s1006_s30, 32, %s1004_s14, %s623_s15  }
 0x2e4 PF: > { %s649_s25 = sand.u32 1, %s829_s26   ;;  %p732_p4 = pnand %p704_p9, %p931_p8 }
 0x2e5   : > { %s650_s9 = scalar_lea.sflag [#allocation5], %s649_s25 }
 0x2e6   : > { %824 = dma.done.wait (!%p732_p4), %s650_s9, 32  }
 0x2e7   : > { %826 = vsyncadd (!%p732_p4), %s650_s9, 4294967264  ;;  %p18_p5 = scmp.ge.s32.totalorder %s912_s8, 4   ;;  %s1058_s26 = smov %s833_s27 }
 0x2e8   : > { %s1059_s27 = smov %s837_s28  ;;  %s1060_s28 = smov %s925_s11 }
 0x2e9   : > { %s1061_s29 = smov %s912_s8  ;;  %20 = sbr.rel (!%p18_p5) target bundleno = 5 (0x5), region = 126 }
 0x2f0   :  { %655 = vsyncpa [#allocation5], 1 }
 0x2f1   :  { %657 = vsyncpa [#allocation5 + $0x1], 1 }

</bundles_post_ra>
